<compile_context>
chip_gen: v7x
topology: tpu7x:2x2x1
jax: 0.10.0
libtpu: 0.0.40
codegen_flags: <defaults>
</compile_context>

<pallas_src>
import functools

import jax
import jax.numpy as jnp
from jax import lax
from jax.experimental import pallas as pl
from jax.experimental.pallas import tpu as pltpu

LANE = 128
MAX_TILE_N = 64 * 1024                   # ~1 MiB of f32 pred per grid step at C=4
VMEM_BUDGET_BYTES = 36 * 1024 * 1024     # inputs (2x buffered) + body temporaries
VMEM_LIMIT_BYTES = 48 * 1024 * 1024      # <= v7x 64 MiB physical; fine on v5e/v6e


def _pick_tile_n(num_classes, n_spatial, pred_itemsize, tgt_itemsize, max_tile_n):
    """Largest lane tile that fits the VMEM budget (inputs + body temporaries)."""
    if n_spatial <= LANE:
        return int(n_spatial)            # full-dim block (allowed even if not 128-aligned)
    # 2x double-buffered inputs + ~8 class-wide f32 temporaries + ~10 row temporaries.
    per_lane = (2 * (num_classes * pred_itemsize + tgt_itemsize)
                + 4 * (8 * num_classes + 10))
    cap = max(LANE, (VMEM_BUDGET_BYTES // per_lane) // LANE * LANE)
    n_up = -(-n_spatial // LANE) * LANE
    tile = min(int(max_tile_n), cap, n_up)
    return max(LANE, (tile // LANE) * LANE)


def _dc_ce_stats_kernel(pred_ref, tgt_ref, stats_ref, *,
                        n_valid, tiles_per_split, any_masking):
    # pred_ref : (C, TN) logits (f32 or bf16)
    # tgt_ref  : (1, TN) integer labels
    # stats_ref: (C, 4)  f32, resident across the spatial ("arbitrary") axis:
    #            col 0 = dice intersection, col 1 = dice denominator (psum+tsum),
    #            col 2 = CE sum (same value in every class row), col 3 = 0.
    s = pl.program_id(1)
    n = pl.program_id(2)
    C, TN = pred_ref.shape

    @pl.when(n == 0)
    def _():
        stats_ref[...] = jnp.zeros_like(stats_ref)

    gt = s * tiles_per_split + n          # global spatial tile index (unclamped)
    tile_start = gt * TN

    def accumulate(masked):
        # NOTE: masked/padded lanes get logits = 0 (NOT -inf) so exp stays finite;
        # their contributions are re-zeroed below via `vf` and onehot == 0.  Do not
        # reuse `probs` unmasked if you edit this path.
        logits = pred_ref[...].astype(jnp.float32)                 # (C, TN)
        tgt = tgt_ref[...].astype(jnp.int32)                       # (1, TN)
        if masked:
            lane = tile_start + lax.broadcasted_iota(jnp.int32, (1, TN), 1)
            valid = lane < n_valid
            vf = valid.astype(jnp.float32)
            logits = jnp.where(valid, logits, 0.0)
            tgt = jnp.where(valid, tgt, -1)

        class_ids = lax.broadcasted_iota(jnp.int32, (C, TN), 0)    # (C, TN)
        onehot = (class_ids == tgt).astype(jnp.float32)            # (C, TN)

        # Softmax / logsumexp over the class (sublane) axis.
        m = jnp.max(logits, axis=0, keepdims=True)                 # (1, TN)
        e = jnp.exp(logits - m)
        denom = jnp.sum(e, axis=0, keepdims=True)                  # (1, TN)
        probs = e * (1.0 / denom)          # exact recip: keeps 1e-4 validation tol
        lse = m + jnp.log(denom)                                   # (1, TN)
        tgt_logit = jnp.sum(logits * onehot, axis=0, keepdims=True)
        ce_row = lse - tgt_logit                                   # (1, TN)
        if masked:
            probs = probs * vf
            ce_row = ce_row * vf

        # Per-tile lane reductions into the tiny resident output block: no wide
        # (C, TN) accumulator read-modify-write stream (the old vst bottleneck).
        inter_t = jnp.sum(probs * onehot, axis=1, keepdims=True)   # (C, 1)
        denom_t = jnp.sum(probs + onehot, axis=1, keepdims=True)   # (C, 1)
        ce_t = jnp.sum(ce_row, axis=1, keepdims=True)              # (1, 1)
        stats_ref[:, 0:1] += inter_t
        stats_ref[:, 1:2] += denom_t
        stats_ref[:, 2:3] += jnp.broadcast_to(ce_t, (C, 1))

    if not any_masking:
        accumulate(False)                 # every tile is full: single fast path
    else:
        needs_mask = (tile_start + TN) > n_valid

        @pl.when(jnp.logical_not(needs_mask))
        def _():
            accumulate(False)

        @pl.when(needs_mask)
        def _():
            accumulate(True)


def dc_and_ce_loss(pred, target, *, smooth=1e-5, weight_ce=1.0, weight_dice=1.0,
                   ignore_classes_index=None, max_tile_n=MAX_TILE_N):
    """pred: (b, c, d, h, w) float logits; target: (b, 1, d, h, w) int labels.

    NOTE: `smooth` is accepted for signature parity but has no effect — the
    PyTorch module instantiates SoftBinaryDiceLoss() with its DEFAULT smooth=1e-5
    (the ctor arg is never forwarded), and we reproduce that quirk exactly.
    """
    del smooth
    B, C = pred.shape[0], pred.shape[1]
    N = 1
    for d in pred.shape[2:]:
        N *= int(d)

    pred_f = pred.reshape(B, C, N)
    if pred_f.dtype not in (jnp.float32, jnp.bfloat16):
        pred_f = pred_f.astype(jnp.float32)      # bf16/f32 stream straight to the kernel
    tgt = target.reshape(B, 1, N)
    if not jnp.issubdtype(tgt.dtype, jnp.integer):
        tgt = tgt.astype(jnp.int32)              # int32/uint8/... stream in native dtype

    tile_n = _pick_tile_n(C, N, jnp.dtype(pred_f.dtype).itemsize,
                          jnp.dtype(tgt.dtype).itemsize, max_tile_n)
    num_tiles = -(-N // tile_n)

    # 2-way spatial split when B is odd (e.g. B==1) so v7x's 2nd TensorCore has
    # work; harmless (one extra stats row) on single-TC v5e/v6e.
    nsplit = 2 if (B % 2 == 1 and num_tiles >= 2) else 1
    tiles_per_split = -(-num_tiles // nsplit)
    any_masking = nsplit * tiles_per_split * tile_n > N

    if nsplit * tiles_per_split > num_tiles:
        # Last split has a fully out-of-range tile: clamp its DMA to the last real
        # tile (data is masked out in-kernel, contributing zero).
        def spatial_block(s, n):
            return jnp.minimum(s * tiles_per_split + n, num_tiles - 1)
    else:
        def spatial_block(s, n):
            return s * tiles_per_split + n

    kernel = functools.partial(_dc_ce_stats_kernel, n_valid=N,
                               tiles_per_split=tiles_per_split,
                               any_masking=any_masking)
    stats = pl.pallas_call(
        kernel,
        out_shape=jax.ShapeDtypeStruct((B, nsplit, C, 4), jnp.float32),
        grid_spec=pltpu.PrefetchScalarGridSpec(
            num_scalar_prefetch=0,
            grid=(B, nsplit, tiles_per_split),
            in_specs=[
                pl.BlockSpec((None, C, tile_n),
                             lambda b, s, n: (b, 0, spatial_block(s, n))),
                pl.BlockSpec((None, 1, tile_n),
                             lambda b, s, n: (b, 0, spatial_block(s, n))),
            ],
            out_specs=pl.BlockSpec((None, None, C, 4),
                                   lambda b, s, n: (b, s, 0, 0)),
        ),
        compiler_params=pltpu.CompilerParams(
            dimension_semantics=("parallel", "parallel", "arbitrary"),
            vmem_limit_bytes=VMEM_LIMIT_BYTES,
        ),
    )(pred_f, tgt)

    inter = jnp.sum(stats[..., 0], axis=1)          # (B, C)
    denom = jnp.sum(stats[..., 1], axis=1)          # (B, C)  == psum + tsum
    ce_sum = jnp.sum(stats[:, :, 0, 2], axis=1)     # (B,)

    dice_smooth = 1e-5                              # PyTorch quirk (see docstring)
    soft_dice = (2.0 * inter + dice_smooth) / (denom + dice_smooth)   # (B, C)
    per_class_loss = 1.0 - jnp.mean(soft_dice, axis=0)                # (C,)
    if ignore_classes_index is not None:
        mask = jnp.ones((C,), jnp.float32).at[ignore_classes_index].set(0.0)
        dc_loss = jnp.sum(per_class_loss * mask) / (C - 1)
    else:
        dc_loss = jnp.sum(per_class_loss) / C

    ce_loss = jnp.sum(ce_sum) / (B * N)             # nn.CrossEntropyLoss mean
    return weight_ce * ce_loss + weight_dice * dc_loss


def _reference_loss(pred, target, weight_ce=1.0, weight_dice=1.0,
                    ignore_classes_index=None):
    """Pure-JAX re-implementation of the PyTorch forward, for verification."""
    B, C = pred.shape[:2]
    probs = jax.nn.softmax(pred, axis=1)
    lbl = target[:, 0].astype(jnp.int32)
    onehot = jnp.stack([(lbl == c).astype(jnp.float32) for c in range(C)], axis=1)
    smooth = 1e-5
    total = 0.0
    for c in range(C):
        if c == ignore_classes_index:
            continue
        p = probs[:, c].reshape(B, -1)
        t = onehot[:, c].reshape(B, -1)
        sd = (2 * (p * t).sum(1) + smooth) / (p.sum(1) + t.sum(1) + smooth)
        total += 1 - sd.sum() / B
    den = C - 1 if ignore_classes_index is not None else C
    dc = total / den
    logp = jax.nn.log_softmax(pred, axis=1)
    ce = -jnp.mean(jnp.take_along_axis(logp, lbl[:, None], axis=1))
    return weight_ce * ce + weight_dice * dc


if __name__ == "__main__":
    key = jax.random.PRNGKey(0)
    ks = jax.random.split(key, 6)

    # Test 1: f32, B even (no split), single ragged tile at the default tile size.
    B, C, D, H, W = 2, 4, 4, 9, 9                        # N = 324
    pred = jax.random.normal(ks[0], (B, C, D, H, W), dtype=jnp.float32)
    target = jax.random.randint(ks[1], (B, 1, D, H, W), 0, C, dtype=jnp.int32)
    out = jax.block_until_ready(dc_and_ce_loss(pred, target))
    ref = _reference_loss(pred, target)
    assert jnp.allclose(out, ref, atol=1e-4, rtol=1e-4), (out, ref)

    # Test 2: B == 1 -> 2-way spatial split (with one clamped fully-OOB tile),
    # ignore_classes_index and non-default weights, forced small tiles.
    B, C, D, H, W = 1, 3, 3, 8, 16                       # N = 384; 3 tiles over 2 splits
    pred = jax.random.normal(ks[2], (B, C, D, H, W), dtype=jnp.float32)
    target = jax.random.randint(ks[3], (B, 1, D, H, W), 0, C, dtype=jnp.int32)
    out = jax.block_until_ready(dc_and_ce_loss(pred, target, weight_ce=0.7,
                                               weight_dice=1.3,
                                               ignore_classes_index=1,
                                               max_tile_n=128))
    ref = _reference_loss(pred, target, 0.7, 1.3, 1)
    assert jnp.allclose(out, ref, atol=1e-4, rtol=1e-4), (out, ref)

    # Test 3: bf16 logits streamed as-is (upcast in VMEM), ragged multi-tile reduction.
    B, C, D, H, W = 2, 5, 2, 8, 10                       # N = 160; 2 tiles, ragged tail
    pred = jax.random.normal(ks[4], (B, C, D, H, W), dtype=jnp.float32).astype(jnp.bfloat16)
    target = jax.random.randint(ks[5], (B, 1, D, H, W), 0, C, dtype=jnp.int32)
    out = jax.block_until_ready(dc_and_ce_loss(pred, target, max_tile_n=128))
    ref = _reference_loss(pred.astype(jnp.float32), target)
    assert jnp.allclose(out, ref, atol=1e-4, rtol=1e-4), (out, ref)

    print("KERNEL_OK")
</pallas_src>

<mosaic_0001>
module attributes {stable_mosaic.version = 11 : i64} {
  func.func @_dc_ce_stats_kernel(%arg0: i32, %arg1: i32, %arg2: i32, %arg3: memref<1x4x384xf32, #tpu.memory_space<vmem>>, %arg4: memref<1x1x384xi32, #tpu.memory_space<vmem>>, %arg5: memref<1x1x4x4xf32, #tpu.memory_space<vmem>>) attributes {dimension_semantics = [#tpu.dimension_semantics<parallel>, #tpu.dimension_semantics<parallel>, #tpu.dimension_semantics<arbitrary>], iteration_bounds = array<i64: 2, 1, 1>, scalar_prefetch = 0 : i64, scratch_operands = 0 : i64, tpu.core_type = #tpu.core_type<tc>, window_params = [{transform_indices = @transform_0, window_bounds = array<i64: 1, 4, 384>}, {transform_indices = @transform_1, window_bounds = array<i64: 1, 1, 384>}, {transform_indices = @transform_2, window_bounds = array<i64: 1, 1, 4, 4>}]} {
    %c0_i32 = arith.constant 0 : i32
    %0 = arith.cmpi eq, %arg2, %c0_i32 : i32
    %1 = arith.extui %0 : i1 to i32
    %c0_i32_0 = arith.constant 0 : i32
    %2 = arith.cmpi ne, %1, %c0_i32_0 : i32
    scf.if %2 {
      %cst = arith.constant 0.000000e+00 : f32
      %13 = vector.broadcast %cst : f32 to vector<4x4xf32>
      %c0 = arith.constant 0 : index
      %c0_4 = arith.constant 0 : index
      %c0_5 = arith.constant 0 : index
      %c0_6 = arith.constant 0 : index
      %14 = vector.load %arg5[%c0, %c0_4, %c0_5, %c0_6] : memref<1x1x4x4xf32, #tpu.memory_space<vmem>>, vector<1x1x4x4xf32>
      %15 = vector.shape_cast %14 : vector<1x1x4x4xf32> to vector<4x4xf32>
      %16 = vector.shape_cast %13 : vector<4x4xf32> to vector<1x1x4x4xf32>
      tpu.vector_store %arg5[%c0, %c0_4, %c0_5, %c0_6], %16 {strides = array<i32>} : memref<1x1x4x4xf32, #tpu.memory_space<vmem>>, vector<1x1x4x4xf32>,
    } else {
    }
    %c1_i32 = arith.constant 1 : i32
    %3 = arith.muli %arg1, %c1_i32 : i32
    %4 = arith.addi %3, %arg2 : i32
    %c384_i32 = arith.constant 384 : i32
    %5 = arith.muli %4, %c384_i32 : i32
    %c384_i32_1 = arith.constant 384 : i32
    %6 = arith.addi %5, %c384_i32_1 : i32
    %c324_i32 = arith.constant 324 : i32
    %7 = arith.cmpi sgt, %6, %c324_i32 : i32
    %true = arith.constant true
    %8 = arith.xori %7, %true : i1
    %9 = arith.extui %8 : i1 to i32
    %c0_i32_2 = arith.constant 0 : i32
    %10 = arith.cmpi ne, %9, %c0_i32_2 : i32
    scf.if %10 {
      %c0 = arith.constant 0 : index
      %c0_4 = arith.constant 0 : index
      %c0_5 = arith.constant 0 : index
      %13 = vector.load %arg3[%c0, %c0_4, %c0_5] : memref<1x4x384xf32, #tpu.memory_space<vmem>>, vector<1x4x384xf32>
      %14 = vector.shape_cast %13 : vector<1x4x384xf32> to vector<4x384xf32>
      %c0_6 = arith.constant 0 : index
      %c0_7 = arith.constant 0 : index
      %c0_8 = arith.constant 0 : index
      %15 = vector.load %arg4[%c0_6, %c0_7, %c0_8] : memref<1x1x384xi32, #tpu.memory_space<vmem>>, vector<1x1x384xi32>
      %16 = vector.shape_cast %15 : vector<1x1x384xi32> to vector<1x384xi32>
      %17 = tpu.iota {dimensions = array<i32: 0>} : vector<4x384xi32>
      %18 = vector.broadcast %16 : vector<1x384xi32> to vector<4x384xi32>
      %19 = arith.cmpi eq, %17, %18 : vector<4x384xi32>
      %20 = arith.extui %19 : vector<4x384xi1> to vector<4x384xi32>
      %21 = arith.sitofp %20 : vector<4x384xi32> to vector<4x384xf32>
      %cst = arith.constant dense<0xFF800000> : vector<384xf32>
      %22 = vector.multi_reduction <maximumf>, %14, %cst [0] : vector<4x384xf32> to vector<384xf32>
      %23 = vector.shape_cast %22 : vector<384xf32> to vector<1x384xf32>
      %24 = vector.broadcast %23 : vector<1x384xf32> to vector<4x384xf32>
      %25 = arith.subf %14, %24 : vector<4x384xf32>
      %26 = math.exp %25 : vector<4x384xf32>
      %cst_9 = arith.constant dense<0.000000e+00> : vector<384xf32>
      %27 = vector.multi_reduction <add>, %26, %cst_9 [0] : vector<4x384xf32> to vector<384xf32>
      %28 = vector.shape_cast %27 : vector<384xf32> to vector<1x384xf32>
      %cst_10 = arith.constant 1.000000e+00 : f32
      %29 = vector.broadcast %cst_10 : f32 to vector<1x384xf32>
      %30 = arith.divf %29, %28 : vector<1x384xf32>
      %31 = vector.broadcast %30 : vector<1x384xf32> to vector<4x384xf32>
      %32 = arith.mulf %26, %31 : vector<4x384xf32>
      %33 = math.log %28 : vector<1x384xf32>
      %34 = arith.addf %23, %33 : vector<1x384xf32>
      %35 = arith.mulf %14, %21 : vector<4x384xf32>
      %cst_11 = arith.constant dense<0.000000e+00> : vector<384xf32>
      %36 = vector.multi_reduction <add>, %35, %cst_11 [0] : vector<4x384xf32> to vector<384xf32>
      %37 = vector.shape_cast %36 : vector<384xf32> to vector<1x384xf32>
      %38 = arith.subf %34, %37 : vector<1x384xf32>
      %39 = arith.mulf %32, %21 : vector<4x384xf32>
      %cst_12 = arith.constant dense<0.000000e+00> : vector<4xf32>
      %40 = vector.multi_reduction <add>, %39, %cst_12 [1] : vector<4x384xf32> to vector<4xf32>
      %41 = vector.shape_cast %40 : vector<4xf32> to vector<4x1xf32>
      %42 = arith.addf %32, %21 : vector<4x384xf32>
      %cst_13 = arith.constant dense<0.000000e+00> : vector<4xf32>
      %43 = vector.multi_reduction <add>, %42, %cst_13 [1] : vector<4x384xf32> to vector<4xf32>
      %44 = vector.shape_cast %43 : vector<4xf32> to vector<4x1xf32>
      %cst_14 = arith.constant dense<0.000000e+00> : vector<1xf32>
      %45 = vector.multi_reduction <add>, %38, %cst_14 [1] : vector<1x384xf32> to vector<1xf32>
      %46 = vector.shape_cast %45 : vector<1xf32> to vector<1x1xf32>
      %c0_15 = arith.constant 0 : index
      %c0_16 = arith.constant 0 : index
      %c0_17 = arith.constant 0 : index
      %c0_18 = arith.constant 0 : index
      %47 = vector.load %arg5[%c0_15, %c0_16, %c0_17, %c0_18] : memref<1x1x4x4xf32, #tpu.memory_space<vmem>>, vector<1x1x4x1xf32>
      %48 = vector.shape_cast %47 : vector<1x1x4x1xf32> to vector<4x1xf32>
      %49 = arith.addf %48, %41 : vector<4x1xf32>
      %c0_19 = arith.constant 0 : index
      %c0_20 = arith.constant 0 : index
      %c0_21 = arith.constant 0 : index
      %c0_22 = arith.constant 0 : index
      %50 = vector.load %arg5[%c0_19, %c0_20, %c0_21, %c0_22] : memref<1x1x4x4xf32, #tpu.memory_space<vmem>>, vector<1x1x4x1xf32>
      %51 = vector.shape_cast %50 : vector<1x1x4x1xf32> to vector<4x1xf32>
      %52 = vector.shape_cast %49 : vector<4x1xf32> to vector<1x1x4x1xf32>
      tpu.vector_store %arg5[%c0_19, %c0_20, %c0_21, %c0_22], %52 {strides = array<i32>} : memref<1x1x4x4xf32, #tpu.memory_space<vmem>>, vector<1x1x4x1xf32>,
      %c0_23 = arith.constant 0 : index
      %c0_24 = arith.constant 0 : index
      %c0_25 = arith.constant 0 : index
      %c1 = arith.constant 1 : index
      %53 = vector.load %arg5[%c0_23, %c0_24, %c0_25, %c1] : memref<1x1x4x4xf32, #tpu.memory_space<vmem>>, vector<1x1x4x1xf32>
      %54 = vector.shape_cast %53 : vector<1x1x4x1xf32> to vector<4x1xf32>
      %55 = arith.addf %54, %44 : vector<4x1xf32>
      %c0_26 = arith.constant 0 : index
      %c0_27 = arith.constant 0 : index
      %c0_28 = arith.constant 0 : index
      %c1_29 = arith.constant 1 : index
      %56 = vector.load %arg5[%c0_26, %c0_27, %c0_28, %c1_29] : memref<1x1x4x4xf32, #tpu.memory_space<vmem>>, vector<1x1x4x1xf32>
      %57 = vector.shape_cast %56 : vector<1x1x4x1xf32> to vector<4x1xf32>
      %58 = vector.shape_cast %55 : vector<4x1xf32> to vector<1x1x4x1xf32>
      tpu.vector_store %arg5[%c0_26, %c0_27, %c0_28, %c1_29], %58 {strides = array<i32>} : memref<1x1x4x4xf32, #tpu.memory_space<vmem>>, vector<1x1x4x1xf32>,
      %c0_30 = arith.constant 0 : index
      %c0_31 = arith.constant 0 : index
      %c0_32 = arith.constant 0 : index
      %c2 = arith.constant 2 : index
      %59 = vector.load %arg5[%c0_30, %c0_31, %c0_32, %c2] : memref<1x1x4x4xf32, #tpu.memory_space<vmem>>, vector<1x1x4x1xf32>
      %60 = vector.shape_cast %59 : vector<1x1x4x1xf32> to vector<4x1xf32>
      %61 = vector.shape_cast %46 : vector<1x1xf32> to vector<1x1xf32>
      %62 = vector.broadcast %61 : vector<1x1xf32> to vector<4x1xf32>
      %63 = arith.addf %60, %62 : vector<4x1xf32>
      %c0_33 = arith.constant 0 : index
      %c0_34 = arith.constant 0 : index
      %c0_35 = arith.constant 0 : index
      %c2_36 = arith.constant 2 : index
      %64 = vector.load %arg5[%c0_33, %c0_34, %c0_35, %c2_36] : memref<1x1x4x4xf32, #tpu.memory_space<vmem>>, vector<1x1x4x1xf32>
      %65 = vector.shape_cast %64 : vector<1x1x4x1xf32> to vector<4x1xf32>
      %66 = vector.shape_cast %63 : vector<4x1xf32> to vector<1x1x4x1xf32>
      tpu.vector_store %arg5[%c0_33, %c0_34, %c0_35, %c2_36], %66 {strides = array<i32>} : memref<1x1x4x4xf32, #tpu.memory_space<vmem>>, vector<1x1x4x1xf32>,
    } else {
    }
    %11 = arith.extui %7 : i1 to i32
    %c0_i32_3 = arith.constant 0 : i32
    %12 = arith.cmpi ne, %11, %c0_i32_3 : i32
    scf.if %12 {
      %c0 = arith.constant 0 : index
      %c0_4 = arith.constant 0 : index
      %c0_5 = arith.constant 0 : index
      %13 = vector.load %arg3[%c0, %c0_4, %c0_5] : memref<1x4x384xf32, #tpu.memory_space<vmem>>, vector<1x4x384xf32>
      %14 = vector.shape_cast %13 : vector<1x4x384xf32> to vector<4x384xf32>
      %c0_6 = arith.constant 0 : index
      %c0_7 = arith.constant 0 : index
      %c0_8 = arith.constant 0 : index
      %15 = vector.load %arg4[%c0_6, %c0_7, %c0_8] : memref<1x1x384xi32, #tpu.memory_space<vmem>>, vector<1x1x384xi32>
      %16 = vector.shape_cast %15 : vector<1x1x384xi32> to vector<1x384xi32>
      %17 = tpu.iota {dimensions = array<i32: 1>} : vector<1x384xi32>
      %18 = vector.broadcast %5 : i32 to vector<1x384xi32>
      %19 = arith.addi %18, %17 : vector<1x384xi32>
      %c324_i32_9 = arith.constant 324 : i32
      %20 = vector.broadcast %c324_i32_9 : i32 to vector<1x384xi32>
      %21 = arith.cmpi slt, %19, %20 : vector<1x384xi32>
      %22 = arith.extui %21 : vector<1x384xi1> to vector<1x384xi32>
      %23 = arith.sitofp %22 : vector<1x384xi32> to vector<1x384xf32>
      %cst = arith.constant 0.000000e+00 : f32
      %24 = vector.shape_cast %21 : vector<1x384xi1> to vector<1x384xi1>
      %25 = vector.broadcast %24 : vector<1x384xi1> to vector<4x384xi1>
      %26 = vector.broadcast %cst : f32 to vector<4x384xf32>
      %27 = arith.select %25, %14, %26 : vector<4x384xi1>, vector<4x384xf32>
      %c-1_i32 = arith.constant -1 : i32
      %28 = vector.broadcast %c-1_i32 : i32 to vector<1x384xi32>
      %29 = arith.select %21, %16, %28 : vector<1x384xi1>, vector<1x384xi32>
      %30 = tpu.iota {dimensions = array<i32: 0>} : vector<4x384xi32>
      %31 = vector.broadcast %29 : vector<1x384xi32> to vector<4x384xi32>
      %32 = arith.cmpi eq, %30, %31 : vector<4x384xi32>
      %33 = arith.extui %32 : vector<4x384xi1> to vector<4x384xi32>
      %34 = arith.sitofp %33 : vector<4x384xi32> to vector<4x384xf32>
      %cst_10 = arith.constant dense<0xFF800000> : vector<384xf32>
      %35 = vector.multi_reduction <maximumf>, %27, %cst_10 [0] : vector<4x384xf32> to vector<384xf32>
      %36 = vector.shape_cast %35 : vector<384xf32> to vector<1x384xf32>
      %37 = vector.broadcast %36 : vector<1x384xf32> to vector<4x384xf32>
      %38 = arith.subf %27, %37 : vector<4x384xf32>
      %39 = math.exp %38 : vector<4x384xf32>
      %cst_11 = arith.constant dense<0.000000e+00> : vector<384xf32>
      %40 = vector.multi_reduction <add>, %39, %cst_11 [0] : vector<4x384xf32> to vector<384xf32>
      %41 = vector.shape_cast %40 : vector<384xf32> to vector<1x384xf32>
      %cst_12 = arith.constant 1.000000e+00 : f32
      %42 = vector.broadcast %cst_12 : f32 to vector<1x384xf32>
      %43 = arith.divf %42, %41 : vector<1x384xf32>
      %44 = vector.broadcast %43 : vector<1x384xf32> to vector<4x384xf32>
      %45 = arith.mulf %39, %44 : vector<4x384xf32>
      %46 = math.log %41 : vector<1x384xf32>
      %47 = arith.addf %36, %46 : vector<1x384xf32>
      %48 = arith.mulf %27, %34 : vector<4x384xf32>
      %cst_13 = arith.constant dense<0.000000e+00> : vector<384xf32>
      %49 = vector.multi_reduction <add>, %48, %cst_13 [0] : vector<4x384xf32> to vector<384xf32>
      %50 = vector.shape_cast %49 : vector<384xf32> to vector<1x384xf32>
      %51 = arith.subf %47, %50 : vector<1x384xf32>
      %52 = vector.broadcast %23 : vector<1x384xf32> to vector<4x384xf32>
      %53 = arith.mulf %45, %52 : vector<4x384xf32>
      %54 = arith.mulf %51, %23 : vector<1x384xf32>
      %55 = arith.mulf %53, %34 : vector<4x384xf32>
      %cst_14 = arith.constant dense<0.000000e+00> : vector<4xf32>
      %56 = vector.multi_reduction <add>, %55, %cst_14 [1] : vector<4x384xf32> to vector<4xf32>
      %57 = vector.shape_cast %56 : vector<4xf32> to vector<4x1xf32>
      %58 = arith.addf %53, %34 : vector<4x384xf32>
      %cst_15 = arith.constant dense<0.000000e+00> : vector<4xf32>
      %59 = vector.multi_reduction <add>, %58, %cst_15 [1] : vector<4x384xf32> to vector<4xf32>
      %60 = vector.shape_cast %59 : vector<4xf32> to vector<4x1xf32>
      %cst_16 = arith.constant dense<0.000000e+00> : vector<1xf32>
      %61 = vector.multi_reduction <add>, %54, %cst_16 [1] : vector<1x384xf32> to vector<1xf32>
      %62 = vector.shape_cast %61 : vector<1xf32> to vector<1x1xf32>
      %c0_17 = arith.constant 0 : index
      %c0_18 = arith.constant 0 : index
      %c0_19 = arith.constant 0 : index
      %c0_20 = arith.constant 0 : index
      %63 = vector.load %arg5[%c0_17, %c0_18, %c0_19, %c0_20] : memref<1x1x4x4xf32, #tpu.memory_space<vmem>>, vector<1x1x4x1xf32>
      %64 = vector.shape_cast %63 : vector<1x1x4x1xf32> to vector<4x1xf32>
      %65 = arith.addf %64, %57 : vector<4x1xf32>
      %c0_21 = arith.constant 0 : index
      %c0_22 = arith.constant 0 : index
      %c0_23 = arith.constant 0 : index
      %c0_24 = arith.constant 0 : index
      %66 = vector.load %arg5[%c0_21, %c0_22, %c0_23, %c0_24] : memref<1x1x4x4xf32, #tpu.memory_space<vmem>>, vector<1x1x4x1xf32>
      %67 = vector.shape_cast %66 : vector<1x1x4x1xf32> to vector<4x1xf32>
      %68 = vector.shape_cast %65 : vector<4x1xf32> to vector<1x1x4x1xf32>
      tpu.vector_store %arg5[%c0_21, %c0_22, %c0_23, %c0_24], %68 {strides = array<i32>} : memref<1x1x4x4xf32, #tpu.memory_space<vmem>>, vector<1x1x4x1xf32>,
      %c0_25 = arith.constant 0 : index
      %c0_26 = arith.constant 0 : index
      %c0_27 = arith.constant 0 : index
      %c1 = arith.constant 1 : index
      %69 = vector.load %arg5[%c0_25, %c0_26, %c0_27, %c1] : memref<1x1x4x4xf32, #tpu.memory_space<vmem>>, vector<1x1x4x1xf32>
      %70 = vector.shape_cast %69 : vector<1x1x4x1xf32> to vector<4x1xf32>
      %71 = arith.addf %70, %60 : vector<4x1xf32>
      %c0_28 = arith.constant 0 : index
      %c0_29 = arith.constant 0 : index
      %c0_30 = arith.constant 0 : index
      %c1_31 = arith.constant 1 : index
      %72 = vector.load %arg5[%c0_28, %c0_29, %c0_30, %c1_31] : memref<1x1x4x4xf32, #tpu.memory_space<vmem>>, vector<1x1x4x1xf32>
      %73 = vector.shape_cast %72 : vector<1x1x4x1xf32> to vector<4x1xf32>
      %74 = vector.shape_cast %71 : vector<4x1xf32> to vector<1x1x4x1xf32>
      tpu.vector_store %arg5[%c0_28, %c0_29, %c0_30, %c1_31], %74 {strides = array<i32>} : memref<1x1x4x4xf32, #tpu.memory_space<vmem>>, vector<1x1x4x1xf32>,
      %c0_32 = arith.constant 0 : index
      %c0_33 = arith.constant 0 : index
      %c0_34 = arith.constant 0 : index
      %c2 = arith.constant 2 : index
      %75 = vector.load %arg5[%c0_32, %c0_33, %c0_34, %c2] : memref<1x1x4x4xf32, #tpu.memory_space<vmem>>, vector<1x1x4x1xf32>
      %76 = vector.shape_cast %75 : vector<1x1x4x1xf32> to vector<4x1xf32>
      %77 = vector.shape_cast %62 : vector<1x1xf32> to vector<1x1xf32>
      %78 = vector.broadcast %77 : vector<1x1xf32> to vector<4x1xf32>
      %79 = arith.addf %76, %78 : vector<4x1xf32>
      %c0_35 = arith.constant 0 : index
      %c0_36 = arith.constant 0 : index
      %c0_37 = arith.constant 0 : index
      %c2_38 = arith.constant 2 : index
      %80 = vector.load %arg5[%c0_35, %c0_36, %c0_37, %c2_38] : memref<1x1x4x4xf32, #tpu.memory_space<vmem>>, vector<1x1x4x1xf32>
      %81 = vector.shape_cast %80 : vector<1x1x4x1xf32> to vector<4x1xf32>
      %82 = vector.shape_cast %79 : vector<4x1xf32> to vector<1x1x4x1xf32>
      tpu.vector_store %arg5[%c0_35, %c0_36, %c0_37, %c2_38], %82 {strides = array<i32>} : memref<1x1x4x4xf32, #tpu.memory_space<vmem>>, vector<1x1x4x1xf32>,
    } else {
    }
    return
  }
  func.func @transform_0(%arg0: i32, %arg1: i32, %arg2: i32) -> (i32, i32, i32) {
    %c1_i32 = arith.constant 1 : i32
    %0 = arith.muli %arg1, %c1_i32 : i32
    %1 = arith.addi %0, %arg2 : i32
    %c0_i32 = arith.constant 0 : i32
    %c0_i32_0 = arith.constant 0 : i32
    return %arg0, %c0_i32, %1 : i32, i32, i32
  }
  func.func @transform_1(%arg0: i32, %arg1: i32, %arg2: i32) -> (i32, i32, i32) {
    %c1_i32 = arith.constant 1 : i32
    %0 = arith.muli %arg1, %c1_i32 : i32
    %1 = arith.addi %0, %arg2 : i32
    %c0_i32 = arith.constant 0 : i32
    %c0_i32_0 = arith.constant 0 : i32
    return %arg0, %c0_i32, %1 : i32, i32, i32
  }
  func.func @transform_2(%arg0: i32, %arg1: i32, %arg2: i32) -> (i32, i32, i32, i32) {
    %c0_i32 = arith.constant 0 : i32
    %c0_i32_0 = arith.constant 0 : i32
    %c0_i32_1 = arith.constant 0 : i32
    return %arg0, %arg1, %c0_i32, %c0_i32_0 : i32, i32, i32, i32
  }
}

</mosaic_0001>

<bundles_post_ra>
// kernel: tpu_custom_call.1
= control target key start
LH: loop header
LB: loop body
LE: loop exit
PB: predicated region body
PF: predicated region fallthrough
CT: control target
= control target key end

     0   :  { %7 = vsyncpa [#allocation3], 0  ;;  %s1329_s0 = inlined_call_operand.hbm [shape: f32[2,4,324], index: 0, kind: input, shape index: {}]   ;;  %s1330_s1 = inlined_call_operand.hbm [shape: s32[2,1,324], index: 1, kind: input, shape index: {}]   ;;  %s1331_s2 = inlined_call_operand.hbm [shape: f32[2,1,4,4], index: 2, kind: output, shape index: {}]  }
   0x1   :  { %9 = vsyncpa [#allocation3 + $0x1], 0 }
   0x2   :  { %10 = vsyncpa [#allocation6], 0 }
   0x3   :  { %12 = vsyncpa [#allocation6 + $0x1], 0 }
   0x4   :  { %13 = vsyncpa [#allocation4], 0 }
   0x5   :  { %15 = vsyncpa [#allocation4 + $0x1], 0  ;;  %s1046_s9 = smov 0   ;;  %s1048_s10 = smov 0  }
   0x6   :  { %s1050_s11 = smov 0   ;;  %s1052_s12 = smov 0  }
   0x7   :  { %s1054_s13 = smov 0   ;;  %s1056_s14 = smov 0  }
   0x8 LB: > { %s767_s15 = sadd.s32 4294967295, %s1025_s14   ;;  %s768_s16 = sadd.s32 4294967294, %s1025_s14   ;;  %s1025_s14 = sphi %s1056_s14, %s21_s14   ;;  %s1021_s13 = sphi %s1054_s13, %s1350_s13   ;;  %s1017_s12 = sphi %s1052_s12, %s1349_s12   ;;  %s1013_s11 = sphi %s1050_s11, %s1348_s11   ;;  %s1009_s10 = sphi %s1048_s10, %s1347_s10   ;;  %s1005_s9 = sphi %s1046_s9, %s1346_s9  }
   0x9   : > { %s40_s17 = sadd.s32 1, %s1021_s13  ;;  %s51_s18 = sadd.s32 1, %s1013_s11 }
   0xa   : > { %p42_p0 = scmp.ge.s32.totalorder %s40_s17, 2  ;;  %p58_p1 = scmp.ne.s32.totalorder %s1013_s11, %s1009_s10 }
   0xb   : > { %p59_p2 = scmp.eq.s32.totalorder %s1025_s14, 0  ;;  %p64_p3 = scmp.ne.s32.totalorder %s1009_s10, %s1005_s9 }
   0xc   : > { %s1352_s17 = smov (%p42_p0, %s40_s17), 0  ;;  %p65_p5 = scmp.eq.s32.totalorder %s767_s15, 0 }
   0xd   : > { %p1087_p4 = por %p59_p2, %p58_p1  ;;  %s46_s20 = ssub.s32 %s1021_s13, %s1352_s17 }
   0xe   : > { %p120_p6 = scmp.eq.s32.totalorder %s767_s15, 1  ;;  %p49_p7 = scmp.eq.s32.totalorder %s46_s20, 0 }
   0xf   : > { %p1093_p8 = por %p65_p5, %p64_p3  ;;  %p126_p10 = scmp.eq.s32.totalorder %s768_s16, 1 }
  0x10   : > { %p1097_p9 = por %p120_p6, %p58_p1  ;;  %p809_p13 = scmp.lt.s32.totalorder %s1025_s14, 2 }
  0x11   : > { %s1335_s21 = scalar_select %p1093_p8, 1, 0 }
  0x12   : > { %s1336_s22 = scalar_select %p1097_p9, 1, 0 }
  0x13   : > { %s1102_s23 = scalar_select %p49_p7, %s1013_s11, %s51_s18  }
  0x14   : > { %p1104_p11 = por %p126_p10, %p64_p3  ;;  %s1111_s25 = sand.u32 1, %s1013_s11  }
  0x15   : > { %s786_s26 = smul.u32 12, %s1111_s25  ;;  %p1117_p0 = pnand %p809_p13, %p1087_p4 }
  0x16   : > { %s1337_s24 = scalar_select %p1104_p11, 1, 0 }
  0x17   : > { %s787_s27 = smul.u32 192, %s1021_s13  ;;  %s150_s4 = scalar_lea.vmem [#allocation2], %s786_s26 }
  0x18   : > { %s161_s5 = sshll.u32 %s150_s4, 4  ;;  %s147_s6 = scalar_lea.sflag [#allocation3], %s1111_s25  ;;  %s1127_s5 = int_to_ptr.vmem [resolvable:$true] %s161_s5 }
  0x19   : > { %s1125_s3 = scalar_lea.hbm %s1329_s0, %s787_s27  ;;  %p881_p3 = pneg %p1117_p0 }
  0x1a   : > { %s879_s7 = scalar_lea.hbm %s1125_s3, 192  ;;  %s884_s16 = scalar_lea.hbm %s1329_s0, 384 }
  0x1b   : > { %p880_p2 = scmp.ne.s32.totalorder %s1125_s3, %s879_s7  ;;  %p885_p6 = scmp.lt.u32.totalorder %s1125_s3, %s1329_s0 }
  0x1c   : > { %p886_p7 = scmp.lt.u32.totalorder %s884_s16, %s879_s7  ;;  %p888_p13 = scmp.lt.u32.totalorder %s879_s7, %s1125_s3 }
  0x1d   : > { %p882_p4 = pnand %p881_p3, %p880_p2 }
  0x1e   : > { %p887_p10 = por %p886_p7, %p885_p6 }
  0x1f   : > { %p883_p5 = pneg %p882_p4 }
  0x20   : > { %p889_p12 = por %p888_p13, %p887_p10 }
  0x22   : > { %p890_p1 = pnand %p889_p12, %p883_p5 }
  0x24   : > { %893 = shalt.err (!%p890_p1)
}
  0x25   : > { %s894_s20 = scalar_lea.vmem %s1127_s5, 192  ;;  %s1027_s26 = smov [#allocation2]  }
  0x26   : > { %p895_p2 = scmp.ne.s32.totalorder %s1127_s5, %s894_s20  ;;  %s899_s27 = sshll.u32 %s1027_s26, 4  ;;  %s900_s27 = int_to_ptr.vmem [resolvable:$false] %s899_s27 }
  0x27   : > { %s901_s29 = scalar_lea.vmem %s900_s27, 384  ;;  %p902_p9 = scmp.lt.s32.totalorder %s1127_s5, %s900_s27 }
  0x28   : > { %p897_p4 = pnand %p895_p2, %p881_p3  ;;  %p903_p6 = scmp.lt.s32.totalorder %s901_s29, %s894_s20 }
  0x2a   : > { %p898_p11 = pneg %p897_p4  ;;  %p904_p7 = por %p903_p6, %p902_p9 }
  0x2c   : > { %p905_p10 = pnand %p904_p7, %p898_p11 }
  0x2e   : > { %908 = shalt.err (!%p905_p10)
}
  0x2f   : > { %801 = dma.hbm_to_vmem [thread:$0]  (!%p1117_p0), %s1125_s3, 192, %s1127_s5, %s147_s6  }
  0x30   : > { %p188_p12 = scmp.lt.s32.totalorder %s1025_s14, 3  ;;  %s788_s30 = smul.u32 3, %s1111_s25 }
  0x31   : > { %p1339_p1 = scmp.ge.s32.totalorder %s1025_s14, 1  ;;  %s789_s7 = smul.u32 48, %s1021_s13 }
  0x32   : > { %s172_s18 = scalar_lea.vmem [#allocation5], %s788_s30  ;;  %s169_s3 = scalar_lea.sflag [#allocation6], %s1111_s25 }
  0x33   : > { %p1159_p5 = pnand %p1339_p1, %p188_p12  ;;  %s1167_s16 = scalar_lea.hbm %s1330_s1, %s789_s7 }
  0x34   : > { %s183_s19 = sshll.u32 %s172_s18, 4  ;;  %s909_s5 = scalar_lea.hbm %s1167_s16, 48  ;;  %s184_s19 = int_to_ptr.vmem [resolvable:$true] %s183_s19 }
  0x35   : > { %s1340_s4 = scalar_select %p1159_p5, 1, 0 }
  0x36   : > { %p910_p9 = scmp.ne.s32.totalorder %s1167_s16, %s909_s5  ;;  %s914_s26 = scalar_lea.hbm %s1330_s1, 96 }
  0x37   : > { %p915_p2 = scmp.lt.u32.totalorder %s1167_s16, %s1330_s1  ;;  %p916_p4 = scmp.lt.u32.totalorder %s914_s26, %s909_s5 }
  0x38   : > { %p912_p11 = pnand %p910_p9, %p881_p3  ;;  %p918_p7 = scmp.lt.u32.totalorder %s909_s5, %s1167_s16 }
  0x39   : > { %p917_p6 = por %p916_p4, %p915_p2 }
  0x3a   : > { %p913_p13 = pneg %p912_p11 }
  0x3b   : > { %p919_p10 = por %p918_p7, %p917_p6 }
  0x3d   : > { %p920_p12 = pnand %p919_p10, %p913_p13 }
  0x3f   : > { %923 = shalt.err (!%p920_p12)
}
  0x40   : > { %s924_s25 = scalar_lea.vmem %s184_s19, 48  ;;  %s1028_s30 = smov [#allocation5]  }
  0x41   : > { %p925_p1 = scmp.ne.s32.totalorder %s184_s19, %s924_s25  ;;  %s929_s7 = sshll.u32 %s1028_s30, 4  ;;  %s930_s7 = int_to_ptr.vmem [resolvable:$false] %s929_s7 }
  0x42   : > { %s931_s8 = scalar_lea.vmem %s930_s7, 96  ;;  %p932_p8 = scmp.lt.s32.totalorder %s184_s19, %s930_s7 }
  0x43   : > { %p927_p9 = pnand %p925_p1, %p881_p3  ;;  %p933_p5 = scmp.lt.s32.totalorder %s931_s8, %s924_s25 }
  0x45   : > { %p928_p11 = pneg %p927_p9  ;;  %p934_p2 = por %p933_p5, %p932_p8 }
  0x47   : > { %p935_p4 = pnand %p934_p2, %p928_p11 }
  0x49   : > { %938 = shalt.err (!%p935_p4)
}
  0x4a   : > { %804 = dma.hbm_to_vmem [thread:$0]  (!%p1117_p0), %s1167_s16, 48, %s184_s19, %s169_s3  }
  0x4b   : > { %p1341_p13 = scmp.ne.s32.totalorder %s1340_s4, 0 }
  0x4c   : > { %s1192_s15 = sand.u32 (!%p1341_p13), 1, %s1009_s10   ;;  %p1342_p3 = scmp.ne.s32.totalorder (!%p1341_p13), %s1335_s21, 0 }
  0x4d   : > { %192 = sbr.rel (%p1341_p13) target bundleno = 336 (0x150), region = 28  ;;  %s195_s5 = scalar_lea.sflag (!%p1341_p13), [#allocation3], %s1192_s15 }
  0x4e   : > { %s790_s18 = smul.u32 (!%p1341_p13), 12, %s1192_s15 }
  0x50   : > { %s198_s6 = scalar_lea.vmem (!%p1341_p13), [#allocation2], %s790_s18 }
  0x54   : > { %992 = dma.done.wait (%p1342_p3), %s195_s5, 192  }
  0x55   : > { %994 = vsyncadd (%p1342_p3), %s195_s5, 4294967104  ;;  %s791_s28 = smul.u32 3, %s1192_s15  ;;  %s204_s4 = scalar_lea.sflag [#allocation6], %s1192_s15 }
  0x57   : > { %s1202_s16 = scalar_lea.vmem [#allocation5], %s791_s28 }
  0x58   : > { %996 = dma.done.wait (%p1342_p3), %s204_s4, 48  }
  0x59   : > { %998 = vsyncadd (%p1342_p3), %s204_s4, 4294967248  ;;  %v436_v0 = vlaneseq  ;;  %s774_s19 = sshll.u32 %s1192_s15, 2  ;;  %vm241_vm0 = vcmask 27648   ;;  %v1029_v2 = vmov 0.0   ;;  %vm500_vm2 = vcmask 1043456   ;;  %v433_v4 = vld [vmem:[%s198_s6] sm:$0xff] }
  0x5a   : > { %s1209_s3 = scalar_lea.vmem [#allocation7], %s774_s19  ;;  %v434_v5 = vld [vmem:[%s198_s6 + $0x8] sm:$0xf]  ;;  %v457_v6 = vcombine.high %v433_v4, %v433_v4  ;;  %v501_v8 = vsel %vm500_vm2, %v433_v4, -inf  ;;  %v435_v26 = vld [vmem:[%s1202_s16] sm:$0x7] }
  0x5b   : > { %v437_v1 = vand.u32 127, %v436_v0  ;;  %242 = vst.msk [vmem:[%s1209_s3] sm:$0xf] %vm241_vm0, %v1029_v2  ;;  %v502_v10 = vrot.slane %v501_v8, 4  ;;  %v463_v17 = vshrl.u32 %v436_v0, 7  ;;  %vm629_vm6 = vcmask 3072  }
  0x5c   : > { %v508_v11 = vsel %vm500_vm2, %v457_v6, -inf  ;;  %vm633_vm7 = vcmask 11272   ;;  %s783_s21 = sshll.u32 %s1017_s12, 6  ;;  %s654_s20 = sshll.u32 %s1209_s3, 4  ;;  %vm637_vm8 = vcmask 19472   ;;  %s1281_s20 = int_to_ptr.vmem [resolvable:$true] %s654_s20 }
  0x5d   : > { %v1213_v3 = vadd.s32 256, %v437_v1  ;;  %v509_v12 = vrot.slane %v508_v11, 4  ;;  %v503_v14 = vmax.f32 %v501_v8, %v502_v10  ;;  %v472_v24 = vsub.s32 2, %v463_v17  ;;  %s1279_s29 = scalar_lea.hbm %s1331_s2, %s783_s21  ;;  %s640_s25 = scalar_lea.sflag [#allocation4], %s1192_s15 }
  0x5e   : > { %v464_v27 = vsub.s32 0, %v463_v17  ;;  %v468_v30 = vsub.s32 1, %v463_v17  ;;  %s939_s30 = scalar_lea.vmem %s1281_s20, 64  ;;  %p1343_p0 = scmp.ne.s32.totalorder %s1336_s22, 0 }
  0x5f   : > { %vm446_vm1 = vcmp.lt.s32.totalorder %v1213_v3, 324  ;;  %v510_v15 = vmax.f32 %v508_v11, %v509_v12  ;;  %v504_v18 = vrot.slane %v503_v14, 2  ;;  %v473_v34 = vrot.slane %v435_v26, %v472_v24  ;;  %p940_p8 = scmp.ne.s32.totalorder %s1281_s20, %s939_s30  ;;  %s1030_s12 = smov [#allocation7]  }
  0x60   : > { %v461_v7 = vsel %vm446_vm1, %v434_v5, 0.0  ;;  %v465_v36 = vrot.slane %v435_v26, %v464_v27  ;;  %v469_v39 = vrot.slane %v435_v26, %v468_v30  ;;  %s943_s7 = sshll.u32 %s1030_s12, 4  ;;  %s944_s7 = int_to_ptr.vmem [resolvable:$false] %s943_s7 }
  0x61   : > { %v515_v9 = vsel %vm500_vm2, %v461_v7, -inf  ;;  %v511_v19 = vrot.slane %v510_v15, 2  ;;  %v505_v21 = vmax.f32 %v503_v14, %v504_v18  ;;  %v476_v43 = vsel %vm446_vm1, %v473_v34, 4294967295  ;;  %p941_p5 = pnand %p940_p8, %p1343_p0  ;;  %s945_s8 = scalar_lea.vmem %s944_s7, 128 }
  0x62   : > { %v516_v13 = vrot.slane %v515_v9, 4  ;;  %v482_v44 = vrot.slane %v465_v36, %v464_v27  ;;  %v486_v45 = vrot.slane %v469_v39, %v464_v27  ;;  %v490_v46 = vrot.slane %v476_v43, %v464_v27  ;;  %p946_p7 = scmp.lt.s32.totalorder %s1281_s20, %s944_s7  ;;  %p947_p10 = scmp.lt.s32.totalorder %s945_s8, %s939_s30 }
  0x63   : > { %v512_v22 = vmax.f32 %v510_v15, %v511_v19  ;;  %v506_v25 = vrot.slane %v505_v21, 1  ;;  %p942_p6 = pneg %p941_p5 }
  0x64   : > { %v517_v16 = vmax.f32 %v515_v9, %v516_v13  ;;  %vm491_vm3 = vcmp.eq.s32.totalorder %v463_v17, %v482_v44  ;;  %vm492_vm4 = vcmp.eq.s32.totalorder %v463_v17, %v486_v45  ;;  %vm493_vm5 = vcmp.eq.s32.totalorder %v463_v17, %v490_v46  ;;  %p948_p12 = por %p947_p10, %p946_p7 }
  0x65   : > { %v513_v28 = vrot.slane %v512_v22, 1  ;;  %v1222_v31 = vmax.f32 %v505_v21, %v506_v25  ;;  %v1234_v47 = vsel %vm491_vm3, 1.0, %v1029_v2  ;;  %v1237_v48 = vsel %vm492_vm4, 1.0, %v1029_v2 }
  0x66   : > { %v518_v20 = vrot.slane %v517_v16, 2  ;;  %v570_v49 = vmul.f32 %v1234_v47, %v433_v4  ;;  %v1241_v51 = vsel %vm493_vm5, 1.0, %v1029_v2  ;;  %v571_v52 = vmul.f32 %v1237_v48, %v457_v6  ;;  %p949_p1 = pnand %p948_p12, %p942_p6 }
  0x67   : > { %v1224_v32 = vmax.f32 %v512_v22, %v513_v28  ;;  %v522_v35 = vsub.f32 %v433_v4, %v1222_v31  ;;  %v572_v55 = vmul.f32 %v1241_v51, %v461_v7 }
  0x68   : > { %v519_v23 = vmax.f32 %v517_v16, %v518_v20  ;;  %v573_v61 = vsel %vm500_vm2, %v570_v49, 0.0  ;;  %v580_v0 = vsel %vm500_vm2, %v571_v52, 0.0 }
  0x69   : > { %v523_v37 = vsub.f32 %v457_v6, %v1224_v32  ;;  %v525_v40 = vmul.f32 1.442695, %v522_v35  ;;  %v587_v4 = vsel %vm500_vm2, %v572_v55, 0.0  ;;  %v574_v8 = vrot.slane %v573_v61, 4 }
  0x6a   : > { %v520_v29 = vrot.slane %v519_v23, 1  ;;  %v581_v9 = vrot.slane %v580_v0, 4  ;;  %v588_v12 = vrot.slane %v587_v4, 4 }
  0x6b   : > { %v527_v41 = vmul.f32 1.442695, %v523_v37  ;;  %861 = vpow2.f32 %v525_v40  ;;  %v575_v16 = vadd.f32 %v574_v8, %v573_v61  ;;  %v778_v40 = vsel %vm446_vm1, 1.0, %v1029_v2 }
  0x6c   : > { %v1226_v33 = vmax.f32 %v519_v23, %v520_v29  ;;  %v582_v18 = vadd.f32 %v581_v9, %v580_v0  ;;  %v589_v21 = vadd.f32 %v588_v12, %v587_v4 }
  0x6d   : > { %863 = vpow2.f32 %v527_v41  ;;  %v576_v24 = vrot.slane %v575_v16, 2 }
  0x6e   : > { %v524_v38 = vsub.f32 %v461_v7, %v1226_v33  ;;  %v583_v25 = vrot.slane %v582_v18, 2  ;;  %v590_v26 = vrot.slane %v589_v21, 2 }
  0x6f   : > { %v577_v27 = vadd.f32 %v576_v24, %v575_v16 }
  0x70   : > { %v529_v42 = vmul.f32 1.442695, %v524_v38  ;;  %v584_v28 = vadd.f32 %v583_v25, %v582_v18  ;;  %v591_v29 = vadd.f32 %v590_v26, %v589_v21 }
  0x71   : > { %v578_v30 = vrot.slane %v577_v27, 1 }
  0x72   : > { %865 = vpow2.f32 %v529_v42  ;;  %v585_v34 = vrot.slane %v584_v28, 1  ;;  %v592_v36 = vrot.slane %v591_v29, 1 }
  0x73   : > { %v579_v42 = vadd.f32 %v578_v30, %v577_v27 }
  0x74   : > { %v586_v49 = vadd.f32 %v585_v34, %v584_v28 }
  0x75   : > { %v862_v50 = vpop.eup %861 }
  0x76   : > { %v531_v54 = vsel %vm500_vm2, %v862_v50, 0.0 }
  0x77   : > { %v864_v53 = vpop.eup %863  ;;  %v532_v57 = vrot.slane %v531_v54, 4 }
  0x78   : > { %v538_v58 = vsel %vm500_vm2, %v864_v53, 0.0 }
  0x79   : > { %v539_v59 = vrot.slane %v538_v58, 4  ;;  %v533_v62 = vadd.f32 %v532_v57, %v531_v54  ;;  %v593_v57 = vadd.f32 %v592_v36, %v591_v29 }
  0x7b   : > { %v540_v1 = vadd.f32 %v539_v59, %v538_v58  ;;  %v534_v5 = vrot.slane %v533_v62, 2 }
  0x7c   : > { %v866_v56 = vpop.eup %865 }
  0x7d   : > { %v545_v60 = vsel %vm500_vm2, %v866_v56, 0.0  ;;  %v541_v7 = vrot.slane %v540_v1, 2  ;;  %v535_v10 = vadd.f32 %v534_v5, %v533_v62 }
  0x7e   : > { %v546_v63 = vrot.slane %v545_v60, 4 }
  0x7f   : > { %v542_v13 = vadd.f32 %v541_v7, %v540_v1  ;;  %v536_v14 = vrot.slane %v535_v10, 1 }
  0x80   : > { %v547_v6 = vadd.f32 %v546_v63, %v545_v60 }
  0x81   : > { %v543_v17 = vrot.slane %v542_v13, 1  ;;  %v537_v19 = vadd.f32 %v536_v14, %v535_v10 }
  0x82   : > { %v548_v11 = vrot.slane %v547_v6, 2 }
  0x83   : > { %v544_v22 = vadd.f32 %v543_v17, %v542_v13  ;;  %867 = vrcp.f32 %v537_v19 }
  0x84   : > { %v549_v15 = vadd.f32 %v548_v11, %v547_v6 }
  0x85   : > { %869 = vrcp.f32 %v544_v22 }
  0x86   : > { %v550_v20 = vrot.slane %v549_v15, 1 }
  0x88   : > { %v551_v23 = vadd.f32 %v550_v20, %v549_v15 }
  0x8a   : > { %871 = vrcp.f32 %v551_v23 }
  0x8b   : > { %873 = vlog2.f32 %v537_v19 }
  0x8c   : > { %875 = vlog2.f32 %v544_v22 }
  0x8d   : > { %877 = vlog2.f32 %v551_v23  ;;  %v868_v35 = vpop.eup %867 }
  0x8e   : > { %v558_v38 = vmul.f32 %v868_v35, %v862_v50 }
  0x8f   : > { %v870_v37 = vpop.eup %869 }
  0x90   : > { %v559_v41 = vmul.f32 %v870_v37, %v864_v53  ;;  %v603_v45 = vmul.f32 %v1234_v47, %v558_v38  ;;  %v613_v46 = vadd.f32 %v1234_v47, %v558_v38 }
  0x92   : > { %v604_v54 = vmul.f32 %v1237_v48, %v559_v41  ;;  %v614_v55 = vadd.f32 %v1237_v48, %v559_v41  ;;  %v606_v2 = vsel %vm500_vm2, %v603_v45, 0.0  ;;  %v616_v3 = vsel %vm500_vm2, %v613_v46, 0.0 }
  0x94   : > { %v872_v39 = vpop.eup %871  ;;  %v617_v60 = vsel %vm500_vm2, %v614_v55, 0.0 }
  0x95   : > { %v874_v43 = vpop.eup %873  ;;  %v560_v44 = vmul.f32 %v872_v39, %v866_v56  ;;  %v607_v56 = vsel %vm500_vm2, %v604_v54, 0.0  ;;  %v618_v0 = vadd.f32 %v617_v60, %v616_v3 }
  0x96   : > { %v876_v52 = vpop.eup %875  ;;  %v562_v50 = vmul.f32 0.6931472, %v874_v43  ;;  %v608_v63 = vadd.f32 %v607_v56, %v606_v2 }
  0x97   : > { %v878_v58 = vpop.eup %877  ;;  %v599_v59 = vmul.f32 %v778_v40, %v560_v44  ;;  %v564_v53 = vmul.f32 0.6931472, %v876_v52 }
  0x98   : > { %v566_v47 = vmul.f32 0.6931472, %v878_v58  ;;  %v567_v61 = vadd.f32 %v562_v50, %v1222_v31 }
  0x99   : > { %v605_v62 = vmul.f32 %v1241_v51, %v599_v59  ;;  %v615_v48 = vadd.f32 %v1241_v51, %v599_v59  ;;  %v568_v1 = vadd.f32 %v564_v53, %v1224_v32 }
  0x9a   : > { %v569_v4 = vadd.f32 %v566_v47, %v1226_v33  ;;  %v594_v5 = vsub.f32 %v567_v61, %v579_v42  ;;  %v627_v33 = vld [vmem:[%s1209_s3] sm:$0xf] }
  0x9b   : > { %v609_v6 = vsel %vm500_vm2, %v605_v62, 0.0  ;;  %v619_v8 = vsel %vm500_vm2, %v615_v48, 0.0  ;;  %v595_v9 = vsub.f32 %v568_v1, %v586_v49 }
  0x9c   : > { %v610_v7 = vadd.f32 %v609_v6, %v608_v63  ;;  %v596_v31 = vsub.f32 %v569_v4, %v593_v57  ;;  %v620_v10 = vadd.f32 %v619_v8, %v618_v0 }
  0x9d   : > { %v623_v11 = vadd.f32 %v595_v9, %v594_v5 }
  0x9e   : > { %611 = vadd.xlane.f32.xlu0 %v610_v7  ;;  %v602_v51 = vmul.f32 %v778_v40, %v596_v31 }
  0xa0   : > { %v624_v32 = vadd.f32 %v623_v11, %v602_v51 }
  0xa2   : > { %621 = vadd.xlane.f32.xlu0 %v620_v10  ;;  %625 = vadd.xlane.f32.xlu1 %v624_v32 }
 0x12b   : > { %v612_v12 = vpop.xlane.xlu0 %611 }
 0x12c   : > { %v628_v13 = vadd.f32 %v627_v33, %v612_v12 }
 0x12e   : > { %630 = vst.msk [vmem:[%s1209_s3] sm:$0xf] %vm629_vm6, %v628_v13 }
 0x12f   : > { %v622_v14 = vpop.xlane.xlu0 %621  ;;  %v626_v17 = vpop.xlane.xlu1 %625 }
 0x135   : > { %v631_v15 = vld [vmem:[%s1209_s3] sm:$0xf] }
 0x136   : > { %v632_v16 = vadd.f32 %v631_v15, %v622_v14 }
 0x138   : > { %634 = vst.msk [vmem:[%s1209_s3] sm:$0xf] %vm633_vm7, %v632_v16 }
 0x13f   : > { %v635_v18 = vld [vmem:[%s1209_s3] sm:$0xf] }
 0x140   : > { %v636_v19 = vadd.f32 %v635_v18, %v626_v17 }
 0x142   : > { %638 = vst.msk [vmem:[%s1209_s3] sm:$0xf] %vm637_vm8, %v636_v19 }
 0x143   : > { %952 = shalt.err (!%p949_p1)
}
 0x144   : > { %s953_s15 = scalar_lea.hbm %s1279_s29, 64  ;;  %s957_s6 = scalar_lea.hbm %s1331_s2, 128 }
 0x145   : > { %p954_p9 = scmp.ne.s32.totalorder %s1279_s29, %s953_s15  ;;  %p958_p4 = scmp.lt.u32.totalorder %s1279_s29, %s1331_s2 }
 0x146   : > { %p959_p13 = scmp.lt.u32.totalorder %s957_s6, %s953_s15  ;;  %p961_p8 = scmp.lt.u32.totalorder %s953_s15, %s1279_s29 }
 0x147   : > { %p955_p11 = pnand %p954_p9, %p1343_p0 }
 0x148   : > { %p960_p3 = por %p959_p13, %p958_p4 }
 0x149   : > { %p956_p2 = pneg %p955_p11 }
 0x14a   : > { %p962_p5 = por %p961_p8, %p960_p3 }
 0x14c   : > { %p963_p6 = pnand %p962_p5, %p956_p2 }
 0x14e   : > { %966 = shalt.err (!%p963_p6)
}
 0x14f   : > { %796 = dma.vmem_to_hbm [thread:$0]  (%p1343_p0), %s1281_s20, 64, %s1279_s29, %s640_s25  }
 0x150 PF: > { %s666_s16 = sand.u32 1, %s1005_s9   ;;  %p1344_p7 = scmp.ne.s32.totalorder %s1337_s24, 0 }
 0x151   : > { %p1345_p10 = scmp.ge.s32.totalorder %s1025_s14, 2  ;;  %s667_s19 = scalar_lea.sflag [#allocation4], %s666_s16 }
 0x153   : > { %p806_p12 = pnand %p1345_p10, %p1344_p7 }
 0x155   : > { %1000 = dma.done.wait (!%p806_p12), %s667_s19, 64  }
 0x156   : > { %1002 = vsyncadd (!%p806_p12), %s667_s19, 4294967232  ;;  %s21_s14 = sadd.s32 1, %s1025_s14   ;;  %s1346_s9 = smov %s1009_s10 }
 0x157   : > { %p18_p1 = scmp.ge.s32.totalorder %s21_s14, 4   ;;  %s1347_s10 = smov %s1013_s11 }
 0x158   : > { %s1348_s11 = smov %s1102_s23  ;;  %s1349_s12 = smov %s1021_s13 }
 0x159   : > { %s1350_s13 = smov %s1352_s17  ;;  %20 = sbr.rel (!%p18_p1) target bundleno = 8 (0x8), region = 98 }
 0x160   :  { %672 = vsyncpa [#allocation3], 1 }
 0x161   :  { %674 = vsyncpa [#allocation3 + $0x1], 1 }
 0x162   :  { %675 = vsyncpa [#allocation6], 1 }
 0x163   :  { %677 = vsyncpa [#allocation6 + $0x1], 1 }
 0x164   :  { %678 = vsyncpa [#allocation4], 1 }
 0x165   :  { %680 = vsyncpa [#allocation4 + $0x1], 1 }

</bundles_post_ra>
